<compile_context>
chip_gen: v6e
topology: v6e:2x2x1
jax: 0.10.0
libtpu: 0.0.40
codegen_flags: <defaults>
</compile_context>

<pallas_src>
import jax
import jax.numpy as jnp
from jax.experimental import pallas as pl
from jax.experimental.pallas import tpu as pltpu


def _ffn_kernel(x_ref, w1_ref, b1_ref, w2_ref, b2_ref, o_ref, acc_ref):
    # x_ref: (tm, d)   w1_ref: (d, th)   b1_ref: (1, th)
    # w2_ref: (th, d)  b2_ref: (1, d)    o_ref: (tm, d)   acc_ref: (tm, d) f32
    k = pl.program_id(1)

    # First linear, hidden block: (tm, d) @ (d, th) -> f32 (tm, th)
    h = jnp.dot(x_ref[...], w1_ref[...], preferred_element_type=jnp.float32)
    h = h + b1_ref[...].astype(jnp.float32)

    # Custom GELU from the reference module (no 0.044715 coefficient):
    # 0.5*h*(1 + tanh(sqrt(2/pi)*(h + h^3)))
    a = jnp.float32(0.7978845608028654)  # sqrt(2/pi)
    t = jnp.tanh(a * (h * (1.0 + h * h)))  # h*(1+h*h) == h + h**3, fused mults
    g = 0.5 * h * (1.0 + t)

    # Second linear (partial over hidden): (tm, th) @ (th, d) -> f32 (tm, d)
    partial = jnp.dot(g.astype(w2_ref.dtype), w2_ref[...],
                      preferred_element_type=jnp.float32)

    # First k-step writes directly (no zero-store + RMW); later steps accumulate.
    @pl.when(k == 0)
    def _():
        acc_ref[...] = partial

    @pl.when(k != 0)
    def _():
        acc_ref[...] += partial

    @pl.when(k == pl.num_programs(1) - 1)
    def _():
        o_ref[...] = (acc_ref[...] + b2_ref[...].astype(jnp.float32)).astype(o_ref.dtype)


def _tile_config():
    """Per-generation (tm, th, VMEM cap) defaults; conservative fallback."""
    try:
        kind = jax.devices()[0].device_kind.lower()
    except Exception:  # pragma: no cover - defensive
        kind = ""
    if "v7" in kind:
        # 64 MiB VMEM, 2 TCs: smaller tiles, cap the scoped budget well below 64 MiB.
        return dict(tm=512, th=512, vmem_cap=56 << 20)
    if "v6" in kind:
        # 128 MiB VMEM, ~650-700 flops/byte roofline: big row tile, th=1024.
        return dict(tm=768, th=1024, vmem_cap=100 << 20)
    if "v5" in kind:
        # v5e: tm=256/th=512 is near-balanced; the key fix is raising the 16 MiB default.
        return dict(tm=256, th=512, vmem_cap=100 << 20)
    # Unknown chip: assume the tightest (v7x-like) budget.
    return dict(tm=512, th=512, vmem_cap=56 << 20)


def feed_forward(x, w1, b1, w2, b2, *, tm=None, th=None, compute_dtype=None):
    """x: [batch, seq, d]; w1: [d, 4d]; b1: [4d]; w2: [4d, d]; b2: [d].

    compute_dtype: optionally pre-cast x/w1/w2 (e.g. jnp.bfloat16) to halve
    weight-streaming HBM traffic on f32 models; accumulation and GELU math
    stay in f32 inside the kernel.
    """
    cfg = _tile_config()
    if tm is None:
        tm = cfg["tm"]
    if th is None:
        th = cfg["th"]
    vmem_cap = cfg["vmem_cap"]

    if compute_dtype is not None:
        x = x.astype(compute_dtype)
        w1 = w1.astype(compute_dtype)
        w2 = w2.astype(compute_dtype)

    batch, seq, d = x.shape
    hidden = w1.shape[1]
    M = batch * seq

    # Clamp tiles to the problem size (keeps the small test shape legal).
    tm = min(tm, M)
    th = min(th, hidden)
    # Prefer >= 2 row tiles so the "parallel" M axis can shard across the two
    # TensorCores on v7x (only when the halves stay sublane-aligned).
    if M // tm < 2 and M % 2 == 0 and (M // 2) % 8 == 0:
        tm = M // 2
    assert M % tm == 0, "batch*seq must be divisible by the row tile"
    assert hidden % th == 0, "hidden (4d) must be divisible by the hidden tile"

    x2 = x.reshape(M, d)
    b1_2 = b1.reshape(1, hidden)
    b2_2 = b2.reshape(1, d)

    in_bytes = jnp.dtype(x.dtype).itemsize
    w_bytes = jnp.dtype(w1.dtype).itemsize
    b_bytes = jnp.dtype(b1.dtype).itemsize
    out_bytes = in_bytes
    grid_m = M // tm

    # Explicit scoped-VMEM budget from the actual tile footprint:
    # each pipelined input/output is double-buffered; acc is a single f32 scratch.
    vmem_need = (
        2 * tm * d * in_bytes      # x tile
        + 2 * d * th * w_bytes     # W1 block
        + 2 * th * b_bytes         # b1 block
        + 2 * th * d * w_bytes     # W2 block
        + 2 * d * b_bytes          # b2
        + tm * d * 4               # f32 accumulator scratch
        + 2 * tm * d * out_bytes   # output tile
    )
    vmem_limit = max(vmem_need + vmem_need // 4 + (2 << 20), 32 << 20)
    vmem_limit = min(vmem_limit, vmem_cap)

    # Cost estimate counts weight re-streaming (weights re-read once per row tile).
    cost = pl.CostEstimate(
        flops=4 * M * d * hidden,                          # two matmuls
        transcendentals=M * hidden,                        # tanh per hidden element
        bytes_accessed=(int(x2.size) * in_bytes
                        + (int(w1.size) + int(w2.size)) * w_bytes * grid_m
                        + (int(b1.size) + int(b2.size)) * b_bytes * grid_m
                        + M * d * out_bytes),
    )

    out2 = pl.pallas_call(
        _ffn_kernel,
        out_shape=jax.ShapeDtypeStruct((M, d), x.dtype),
        grid_spec=pltpu.PrefetchScalarGridSpec(
            num_scalar_prefetch=0,
            # NOTE: the hidden/reduction axis MUST stay last and "arbitrary";
            # the f32 accumulator-in-scratch pattern depends on it.
            grid=(grid_m, hidden // th),
            in_specs=[
                pl.BlockSpec((tm, d), lambda i, k: (i, 0)),   # x tile (resident over k)
                pl.BlockSpec((d, th), lambda i, k: (0, k)),   # W1 hidden block (streamed)
                pl.BlockSpec((1, th), lambda i, k: (0, k)),   # b1 hidden block
                pl.BlockSpec((th, d), lambda i, k: (k, 0)),   # W2 hidden block (streamed)
                pl.BlockSpec((1, d), lambda i, k: (0, 0)),    # b2
            ],
            out_specs=pl.BlockSpec((tm, d), lambda i, k: (i, 0)),  # accumulated across k
            scratch_shapes=[pltpu.VMEM((tm, d), jnp.float32)],     # f32 accumulator
        ),
        compiler_params=pltpu.CompilerParams(
            dimension_semantics=("parallel", "arbitrary"),
            vmem_limit_bytes=int(vmem_limit),
        ),
        cost_estimate=cost,
    )(x2, w1, b1_2, w2, b2_2)

    return out2.reshape(batch, seq, d)


def _reference(x, w1, b1, w2, b2):
    h = jnp.einsum("bsd,dh->bsh", x, w1) + b1
    a = jnp.sqrt(2.0 / jnp.pi)
    t = jnp.tanh(a * (h + h ** 3))
    g = 0.5 * h * (1.0 + t)
    return jnp.einsum("bsh,hd->bsd", g, w2) + b2


if __name__ == "__main__":
    d = 32
    hidden = 4 * d
    batch, seq = 2, 8

    key = jax.random.PRNGKey(0)
    k_x, k_w1, k_b1, k_w2, k_b2 = jax.random.split(key, 5)

    x = jax.random.normal(k_x, (batch, seq, d), dtype=jnp.float32)
    # Deterministic init mimicking nn.Linear's uniform(-1/sqrt(in), 1/sqrt(in))
    lim1 = 1.0 / jnp.sqrt(jnp.float32(d))
    lim2 = 1.0 / jnp.sqrt(jnp.float32(hidden))
    w1 = jax.random.uniform(k_w1, (d, hidden), jnp.float32, -lim1, lim1)
    b1 = jax.random.uniform(k_b1, (hidden,), jnp.float32, -lim1, lim1)
    w2 = jax.random.uniform(k_w2, (hidden, d), jnp.float32, -lim2, lim2)
    b2 = jax.random.uniform(k_b2, (d,), jnp.float32, -lim2, lim2)

    # compute_dtype left as None (f32) so the tight-tolerance check against the
    # f32 reference is meaningful; production f32 models should pass
    # compute_dtype=jnp.bfloat16 (and loosen tolerances accordingly).
    out = feed_forward(x, w1, b1, w2, b2)
    jax.block_until_ready(out)

    ref = _reference(x, w1, b1, w2, b2)
    assert out.shape == (batch, seq, d)
    assert jnp.allclose(out, ref, atol=1e-5, rtol=1e-5)

    print("KERNEL_OK")
</pallas_src>

<mosaic_0001>
module attributes {stable_mosaic.version = 11 : i64} {
  func.func @_ffn_kernel(%arg0: i32, %arg1: i32, %arg2: memref<8x32xf32, #tpu.memory_space<vmem>>, %arg3: memref<32x128xf32, #tpu.memory_space<vmem>>, %arg4: memref<1x128xf32, #tpu.memory_space<vmem>>, %arg5: memref<128x32xf32, #tpu.memory_space<vmem>>, %arg6: memref<1x32xf32, #tpu.memory_space<vmem>>, %arg7: memref<8x32xf32, #tpu.memory_space<vmem>>, %arg8: memref<8x32xf32, #tpu.memory_space<vmem>>) attributes {dimension_semantics = [#tpu.dimension_semantics<parallel>, #tpu.dimension_semantics<arbitrary>], iteration_bounds = array<i64: 2, 1>, scalar_prefetch = 0 : i64, scratch_operands = 1 : i64, tpu.core_type = #tpu.core_type<tc>, window_params = [{transform_indices = @transform_0, window_bounds = array<i64: 8, 32>}, {transform_indices = @transform_1, window_bounds = array<i64: 32, 128>}, {transform_indices = @transform_2, window_bounds = array<i64: 1, 128>}, {transform_indices = @transform_3, window_bounds = array<i64: 128, 32>}, {pipeline_mode = #tpu.pipeline_mode<synchronous>, transform_indices = @transform_4, window_bounds = array<i64: 1, 32>}, {transform_indices = @transform_5, window_bounds = array<i64: 8, 32>}]} {
    %c0 = arith.constant 0 : index
    %c0_0 = arith.constant 0 : index
    %0 = vector.load %arg2[%c0, %c0_0] : memref<8x32xf32, #tpu.memory_space<vmem>>, vector<8x32xf32>
    %c0_1 = arith.constant 0 : index
    %c0_2 = arith.constant 0 : index
    %1 = vector.load %arg3[%c0_1, %c0_2] : memref<32x128xf32, #tpu.memory_space<vmem>>, vector<32x128xf32>
    %cst = arith.constant dense<0.000000e+00> : vector<8x128xf32>
    %2 = tpu.matmul %0, %1, %cst {dimension_numbers = #tpu.dot_dimension_numbers<[1], [0], [0], [1], [0, 0, 1, 1], [], []>} : vector<8x32xf32>, vector<32x128xf32>, vector<8x128xf32> -> vector<8x128xf32>
    %c0_3 = arith.constant 0 : index
    %c0_4 = arith.constant 0 : index
    %3 = vector.load %arg4[%c0_3, %c0_4] : memref<1x128xf32, #tpu.memory_space<vmem>>, vector<1x128xf32>
    %4 = vector.broadcast %3 : vector<1x128xf32> to vector<8x128xf32>
    %5 = arith.addf %2, %4 : vector<8x128xf32>
    %6 = arith.mulf %5, %5 : vector<8x128xf32>
    %cst_5 = arith.constant 1.000000e+00 : f32
    %7 = vector.broadcast %cst_5 : f32 to vector<8x128xf32>
    %8 = arith.addf %7, %6 : vector<8x128xf32>
    %9 = arith.mulf %5, %8 : vector<8x128xf32>
    %cst_6 = arith.constant 0.797884583 : f32
    %10 = vector.broadcast %cst_6 : f32 to vector<8x128xf32>
    %11 = arith.mulf %10, %9 : vector<8x128xf32>
    %12 = math.tanh %11 : vector<8x128xf32>
    %cst_7 = arith.constant 5.000000e-01 : f32
    %13 = vector.broadcast %cst_7 : f32 to vector<8x128xf32>
    %14 = arith.mulf %13, %5 : vector<8x128xf32>
    %cst_8 = arith.constant 1.000000e+00 : f32
    %15 = vector.broadcast %cst_8 : f32 to vector<8x128xf32>
    %16 = arith.addf %15, %12 : vector<8x128xf32>
    %17 = arith.mulf %14, %16 : vector<8x128xf32>
    %c0_9 = arith.constant 0 : index
    %c0_10 = arith.constant 0 : index
    %18 = vector.load %arg5[%c0_9, %c0_10] : memref<128x32xf32, #tpu.memory_space<vmem>>, vector<128x32xf32>
    %cst_11 = arith.constant dense<0.000000e+00> : vector<8x32xf32>
    %19 = tpu.matmul %17, %18, %cst_11 {dimension_numbers = #tpu.dot_dimension_numbers<[1], [0], [0], [1], [0, 0, 1, 1], [], []>} : vector<8x128xf32>, vector<128x32xf32>, vector<8x32xf32> -> vector<8x32xf32>
    %c0_i32 = arith.constant 0 : i32
    %20 = arith.cmpi eq, %arg1, %c0_i32 : i32
    %21 = arith.extui %20 : i1 to i32
    %c0_i32_12 = arith.constant 0 : i32
    %22 = arith.cmpi ne, %21, %c0_i32_12 : i32
    scf.if %22 {
      %c0_17 = arith.constant 0 : index
      %c0_18 = arith.constant 0 : index
      %29 = vector.load %arg8[%c0_17, %c0_18] : memref<8x32xf32, #tpu.memory_space<vmem>>, vector<8x32xf32>
      tpu.vector_store %arg8[%c0_17, %c0_18], %19 {strides = array<i32>} : memref<8x32xf32, #tpu.memory_space<vmem>>, vector<8x32xf32>,
    } else {
    }
    %c0_i32_13 = arith.constant 0 : i32
    %23 = arith.cmpi ne, %arg1, %c0_i32_13 : i32
    %24 = arith.extui %23 : i1 to i32
    %c0_i32_14 = arith.constant 0 : i32
    %25 = arith.cmpi ne, %24, %c0_i32_14 : i32
    scf.if %25 {
      %c0_17 = arith.constant 0 : index
      %c0_18 = arith.constant 0 : index
      %29 = vector.load %arg8[%c0_17, %c0_18] : memref<8x32xf32, #tpu.memory_space<vmem>>, vector<8x32xf32>
      %30 = arith.addf %29, %19 : vector<8x32xf32>
      %c0_19 = arith.constant 0 : index
      %c0_20 = arith.constant 0 : index
      %31 = vector.load %arg8[%c0_19, %c0_20] : memref<8x32xf32, #tpu.memory_space<vmem>>, vector<8x32xf32>
      tpu.vector_store %arg8[%c0_19, %c0_20], %30 {strides = array<i32>} : memref<8x32xf32, #tpu.memory_space<vmem>>, vector<8x32xf32>,
    } else {
    }
    %c0_i32_15 = arith.constant 0 : i32
    %26 = arith.cmpi eq, %arg1, %c0_i32_15 : i32
    %27 = arith.extui %26 : i1 to i32
    %c0_i32_16 = arith.constant 0 : i32
    %28 = arith.cmpi ne, %27, %c0_i32_16 : i32
    scf.if %28 {
      %c0_17 = arith.constant 0 : index
      %c0_18 = arith.constant 0 : index
      %29 = vector.load %arg8[%c0_17, %c0_18] : memref<8x32xf32, #tpu.memory_space<vmem>>, vector<8x32xf32>
      %c0_19 = arith.constant 0 : index
      %c0_20 = arith.constant 0 : index
      %30 = vector.load %arg6[%c0_19, %c0_20] : memref<1x32xf32, #tpu.memory_space<vmem>>, vector<1x32xf32>
      %31 = vector.broadcast %30 : vector<1x32xf32> to vector<8x32xf32>
      %32 = arith.addf %29, %31 : vector<8x32xf32>
      %c0_21 = arith.constant 0 : index
      %c0_22 = arith.constant 0 : index
      %33 = vector.load %arg7[%c0_21, %c0_22] : memref<8x32xf32, #tpu.memory_space<vmem>>, vector<8x32xf32>
      tpu.vector_store %arg7[%c0_21, %c0_22], %32 {strides = array<i32>} : memref<8x32xf32, #tpu.memory_space<vmem>>, vector<8x32xf32>,
    } else {
    }
    return
  }
  func.func @transform_0(%arg0: i32, %arg1: i32) -> (i32, i32) {
    %c0_i32 = arith.constant 0 : i32
    %c0_i32_0 = arith.constant 0 : i32
    return %arg0, %c0_i32 : i32, i32
  }
  func.func @transform_1(%arg0: i32, %arg1: i32) -> (i32, i32) {
    %c0_i32 = arith.constant 0 : i32
    %c0_i32_0 = arith.constant 0 : i32
    return %c0_i32, %arg1 : i32, i32
  }
  func.func @transform_2(%arg0: i32, %arg1: i32) -> (i32, i32) {
    %c0_i32 = arith.constant 0 : i32
    %c0_i32_0 = arith.constant 0 : i32
    return %c0_i32, %arg1 : i32, i32
  }
  func.func @transform_3(%arg0: i32, %arg1: i32) -> (i32, i32) {
    %c0_i32 = arith.constant 0 : i32
    %c0_i32_0 = arith.constant 0 : i32
    return %arg1, %c0_i32 : i32, i32
  }
  func.func @transform_4(%arg0: i32, %arg1: i32) -> (i32, i32) {
    %c0_i32 = arith.constant 0 : i32
    %c0_i32_0 = arith.constant 0 : i32
    %c0_i32_1 = arith.constant 0 : i32
    return %c0_i32, %c0_i32_0 : i32, i32
  }
  func.func @transform_5(%arg0: i32, %arg1: i32) -> (i32, i32) {
    %c0_i32 = arith.constant 0 : i32
    %c0_i32_0 = arith.constant 0 : i32
    return %arg0, %c0_i32 : i32, i32
  }
}

</mosaic_0001>

<bundles_post_ra>
// kernel: tpu_custom_call.1
= control target key start
LH: loop header
LB: loop body
LE: loop exit
PB: predicated region body
PF: predicated region fallthrough
CT: control target
= control target key end

     0   :  { %10 = vsyncpa [#allocation4], 0  ;;  %s1058_s0 = inlined_call_operand.vmem [shape: f32[16,32], index: 0, kind: input, shape index: {}]   ;;  %s1059_s1 = inlined_call_operand.vmem [shape: f32[32,128], index: 1, kind: input, shape index: {}]   ;;  %s1060_s2 = inlined_call_operand.vmem [shape: f32[1,128], index: 2, kind: input, shape index: {}]   ;;  %s1061_s3 = inlined_call_operand.vmem [shape: f32[128,32], index: 3, kind: input, shape index: {}]   ;;  %s1062_s4 = inlined_call_operand.vmem [shape: f32[1,32], index: 4, kind: input, shape index: {}]   ;;  %s1063_s5 = inlined_call_operand.hbm [shape: f32[16,32], index: 5, kind: output, shape index: {}]  }
   0x1   :  { %12 = vsyncpa [#allocation4 + $0x1], 0  ;;  %s868_s18 = smov 0   ;;  %s870_s19 = smov 0  }
   0x2   :  { %s872_s20 = smov 0   ;;  %s874_s21 = smov 0  }
   0x3   :  { %s876_s22 = smov 0   ;;  %s878_s23 = smov 0  }
   0x4 LB: > { %s613_s24 = sadd.s32 4294967295, %s833_s23   ;;  %s614_s25 = sadd.s32 4294967294, %s833_s23   ;;  %s833_s23 = sphi %s878_s23, %s18_s23   ;;  %s829_s22 = sphi %s876_s22, %s1070_s22   ;;  %s825_s21 = sphi %s874_s21, %s1069_s21   ;;  %s821_s20 = sphi %s872_s20, %s1068_s20   ;;  %s817_s19 = sphi %s870_s19, %s1067_s19   ;;  %s813_s18 = sphi %s868_s18, %s1066_s18  }
   0x5   : > { %s30_s26 = sadd.s32 1, %s829_s22  ;;  %s162_s27 = sadd.s32 1, %s821_s20 }
   0x6   : > { %p32_p0 = scmp.ge.s32.totalorder %s30_s26, 2  ;;  %p172_p1 = scmp.ne.s32.totalorder %s821_s20, %s817_s19 }
   0x7   : > { %p173_p2 = scmp.eq.s32.totalorder %s613_s24, 1  ;;  %p178_p3 = scmp.ne.s32.totalorder %s817_s19, %s813_s18 }
   0x8   : > { %s1072_s26 = smov (%p32_p0, %s30_s26), 0  ;;  %p179_p5 = scmp.eq.s32.totalorder %s614_s25, 1 }
   0x9   : > { %p908_p4 = por %p173_p2, %p172_p1  ;;  %s159_s29 = ssub.s32 %s829_s22, %s1072_s26 }
   0xa   : > { %p620_p6 = scmp.ge.s32.totalorder %s833_s23, 1  ;;  %p160_p7 = scmp.eq.s32.totalorder %s159_s29, 0 }
   0xb   : > { %p915_p8 = por %p179_p5, %p178_p3  ;;  %p229_p9 = scmp.lt.s32.totalorder %s833_s23, 3 }
   0xc   : > { %s921_s6 = scalar_select %p160_p7, %s821_s20, %s162_s27  }
   0xd   : > { %p230_p10 = pnand %p620_p6, %p229_p9 }
   0xe   : > { %p268_p11 = scmp.lt.s32.totalorder (!%p230_p10), %s825_s21, 1  ;;  %s265_s9 = sand.u32 (!%p230_p10), 1, %s817_s19  }
   0xf   : > { %233 = sbr.rel (%p230_p10) target bundleno = 466 (0x1d2), region = 40  ;;  %s621_s10 = sshll.u32 (!%p230_p10), %s265_s9, 3 }
  0x10   : > { %s267_s14 = scalar_lea.vmem (!%p230_p10), [#allocation3], %s621_s10  ;;  %s491_s25 = scalar_lea.sflag (!%p230_p10), [#allocation4], %s265_s9 }
  0x11   : > { %s504_s15 = sshll.u32 (!%p230_p10), %s267_s14, 4  ;;  %s505_s15 = int_to_ptr.vmem [resolvable:$true] %s504_s15 }
  0x12   : > { %s757_s27 = scalar_lea.vmem (!%p230_p10), %s505_s15, 128 }
  0x13   : > { %p758_p12 = scmp.ne.s32.totalorder (!%p230_p10), %s505_s15, %s757_s27 }
  0x14   : > { %v289_v0 = vld [vmem:[%s1059_s1 + $0x18] sm:$0xff]  ;;  %v835_v1 = vmov 0.0   ;;  %v288_v2 = vld [vmem:[%s1059_s1 + $0x10] sm:$0xff]  ;;  %vm836_vm0 = vmmov 0   ;;  %s269_s13 = scalar_select %p268_p11, %s825_s21, 1  ;;  %v287_v4 = vld [vmem:[%s1059_s1 + $0x8] sm:$0xff] }
  0x15   : > { %652 = vmatprep.subr.mxu0 %v835_v1  ;;  %660 = vmatprep.mubr.msk.f32.mxu0 %vm836_vm0, %v835_v1  ;;  %v394_v3 = vld [vmem:[%s1061_s3 + $0x78] sm:$0xff]  ;;  %v286_v5 = vld [vmem:[%s1059_s1] sm:$0xff]  ;;  %vm297_vm1 = vcmask 261120   ;;  %v393_v7 = vld [vmem:[%s1061_s3 + $0x70] sm:$0xff]  ;;  %p759_p13 = pnand %p758_p12, %p908_p4 }
  0x16   : > { %653 = vmatpush3.msra.mxu0 %v289_v0  ;;  %663 = vmatprep.subr.mxu1 %v835_v1  ;;  %s622_s16 = sshll.u32 %s269_s13, 3  ;;  %v392_v8 = vld [vmem:[%s1061_s3 + $0x68] sm:$0xff]  ;;  %v391_v9 = vld [vmem:[%s1061_s3 + $0x60] sm:$0xff]  ;;  %v390_v10 = vld [vmem:[%s1061_s3 + $0x58] sm:$0xff]  ;;  %s627_s13 = sshll.u32 %s825_s21, 7 }
  0x17   : > { %654 = vmatprep.subr.mxu0 %v835_v1  ;;  %664 = vmatpush3.msra.mxu1 %v394_v3  ;;  %s271_s29 = scalar_lea.vmem %s1058_s0, %s622_s16  ;;  %v389_v11 = vld [vmem:[%s1061_s3 + $0x50] sm:$0xff]  ;;  %v388_v12 = vld [vmem:[%s1061_s3 + $0x48] sm:$0xff]  ;;  %v387_v13 = vld [vmem:[%s1061_s3 + $0x40] sm:$0xff]  ;;  %s502_s24 = scalar_lea.hbm %s1063_s5, %s627_s13 }
  0x18   : > { %655 = vmatpush3.msra.mxu0 %v288_v2  ;;  %665 = vmatprep.subr.mxu1 %v835_v1  ;;  %v285_v6 = vld [vmem:[%s271_s29] sm:$0xff]  ;;  %v386_v14 = vld [vmem:[%s1061_s3 + $0x38] sm:$0xff]  ;;  %v385_v15 = vld [vmem:[%s1061_s3 + $0x30] sm:$0xff]  ;;  %p760_p0 = pneg %p759_p13  ;;  %s837_s29 = smov [#allocation3]  }
  0x19   : > { %656 = vmatprep.subr.mxu0 %v835_v1  ;;  %695 = vmatprep.mubr.msk.f32.mxu1 %vm836_vm0, %v835_v1  ;;  %v384_v16 = vld [vmem:[%s1061_s3 + $0x28] sm:$0xff]  ;;  %v383_v17 = vld [vmem:[%s1061_s3 + $0x20] sm:$0xff]  ;;  %v382_v18 = vld [vmem:[%s1061_s3 + $0x18] sm:$0xff]  ;;  %s761_s7 = sshll.u32 %s837_s29, 4  ;;  %s762_s7 = int_to_ptr.vmem [resolvable:$false] %s761_s7 }
  0x1a   : > { %657 = vmatpush3.msra.mxu0 %v287_v4  ;;  %666 = vmatpush3.msra.mxu1 %v393_v7  ;;  %v381_v19 = vld [vmem:[%s1061_s3 + $0x10] sm:$0xff]  ;;  %v380_v20 = vld [vmem:[%s1061_s3 + $0x8] sm:$0xff]  ;;  %v379_v21 = vld [vmem:[%s1061_s3] sm:$0xff]  ;;  %s763_s21 = scalar_lea.vmem %s762_s7, 256  ;;  %p764_p1 = scmp.lt.s32.totalorder %s505_s15, %s762_s7 }
  0x1b   : > { %658 = vmatprep.subr.mxu0 %v835_v1  ;;  %667 = vmatprep.subr.mxu1 %v835_v1  ;;  %v623_v22 = vld [vmem:[%s1060_s2] ss:$0 sm:$0xff]  ;;  %p765_p2 = scmp.lt.s32.totalorder %s763_s21, %s757_s27 }
  0x1c   : > { %659 = vmatpush3.msra.mxu0 %v286_v5  ;;  %668 = vmatpush3.msra.mxu1 %v392_v8  ;;  %v625_v36 = vld [vmem:[%s1062_s4] ss:$0 sm:$0xff] }
  0x1d   : > { %661 = vmatmul.mubr.msk.f32.vlgmr.msra.gmra.mxu0 %vm297_vm1, %v285_v6  ;;  %669 = vmatprep.subr.mxu1 %v835_v1  ;;  %p766_p3 = por %p765_p2, %p764_p1 }
  0x1e   : > { %670 = vmatpush3.msra.mxu1 %v391_v9 }
  0x1f   : > { %671 = vmatprep.subr.mxu1 %v835_v1  ;;  %p767_p5 = pnand %p766_p3, %p760_p0 }
  0x20   : > { %672 = vmatpush3.msra.mxu1 %v390_v10 }
  0x21   : > { %673 = vmatprep.subr.mxu1 %v835_v1 }
  0x22   : > { %674 = vmatpush3.msra.mxu1 %v389_v11 }
  0x23   : > { %675 = vmatprep.subr.mxu1 %v835_v1 }
  0x24   : > { %676 = vmatpush3.msra.mxu1 %v388_v12 }
  0x25   : > { %677 = vmatprep.subr.mxu1 %v835_v1 }
  0x26   : > { %678 = vmatpush3.msra.mxu1 %v387_v13 }
  0x27   : > { %679 = vmatprep.subr.mxu1 %v835_v1 }
  0x28   : > { %680 = vmatpush3.msra.mxu1 %v386_v14 }
  0x29   : > { %681 = vmatprep.subr.mxu1 %v835_v1 }
  0x2a   : > { %682 = vmatpush3.msra.mxu1 %v385_v15 }
  0x2b   : > { %683 = vmatprep.subr.mxu1 %v835_v1 }
  0x2c   : > { %684 = vmatpush3.msra.mxu1 %v384_v16 }
  0x2d   : > { %685 = vmatprep.subr.mxu1 %v835_v1 }
  0x2e   : > { %686 = vmatpush3.msra.mxu1 %v383_v17 }
  0x2f   : > { %687 = vmatprep.subr.mxu1 %v835_v1 }
  0x30   : > { %688 = vmatpush3.msra.mxu1 %v382_v18 }
  0x31   : > { %689 = vmatprep.subr.mxu1 %v835_v1 }
  0x32   : > { %690 = vmatpush3.msra.mxu1 %v381_v19 }
  0x33   : > { %691 = vmatprep.subr.mxu1 %v835_v1 }
  0x34   : > { %692 = vmatpush3.msra.mxu1 %v380_v20 }
  0x35   : > { %693 = vmatprep.subr.mxu1 %v835_v1 }
  0x36   : > { %694 = vmatpush3.msra.mxu1 %v379_v21 }
  0xdd   : > { %v367_v23 = vpop.f32.mrf.mxu0 }
  0xde   : > { %v368_v24 = vadd.f32 %v623_v22, %v367_v23 }
  0xdf   : > { %v662_v25 = vpop.f32.mrf.mxu0 }
  0xe0   : > { %v371_v26 = vmul.f32 %v368_v24, %v368_v24  ;;  %v376_v31 = vmul.f32 0.5, %v368_v24 }
  0xe2   : > { %v372_v27 = vadd.f32 1.0, %v371_v26 }
  0xe4   : > { %v373_v28 = vmul.f32 %v372_v27, %v368_v24 }
  0xe6   : > { %v374_v29 = vmul.f32 0.7978846, %v373_v28 }
  0xe8   : > { %755 = vtanh.f32 %v374_v29 }
  0xf5   : > { %v756_v30 = vpop.eup %755 }
  0xf6   : > { %v377_v32 = vadd.f32 1.0, %v756_v30 }
  0xf8   : > { %v378_v33 = vmul.f32 %v377_v32, %v376_v31 }
  0xfa   : > { %696 = vmatmul.mubr.f32.vlgmr.msra.gmra.mxu1 %v378_v33 }
 0x1ba   : > { %v461_v34 = vpop.f32.mrf.mxu1 }
 0x1bb   : > { %469 = vst.msk [vmem:[#allocation2] sm:$0xff] %vm297_vm1, %v461_v34 }
 0x1bc   : > { %v697_v35 = vpop.f32.mrf.mxu1 }
 0x1c2   : > { %v480_v37 = vld [vmem:[#allocation2] sm:$0xff] }
 0x1c3   : > { %v488_v38 = vadd.f32 %v625_v36, %v480_v37 }
 0x1c5   : > { %489 = vst.msk [vmem:[%s267_s14] sm:$0xff] %vm297_vm1, %v488_v38 }
 0x1c6   : > { %770 = shalt.err (!%p767_p5)
}
 0x1c7   : > { %s771_s8 = scalar_lea.hbm %s502_s24, 128  ;;  %s775_s11 = scalar_lea.hbm %s1063_s5, 256 }
 0x1c8   : > { %p772_p6 = scmp.ne.s32.totalorder %s502_s24, %s771_s8  ;;  %p776_p10 = scmp.lt.s32.totalorder %s502_s24, %s1063_s5 }
 0x1c9   : > { %p777_p11 = scmp.lt.s32.totalorder %s775_s11, %s771_s8 }
 0x1ca   : > { %p773_p7 = pnand %p772_p6, %p908_p4 }
 0x1cb   : > { %p778_p12 = por %p777_p11, %p776_p10 }
 0x1cc   : > { %p774_p9 = pneg %p773_p7 }
 0x1ce   : > { %p779_p13 = pnand %p778_p12, %p774_p9 }
 0x1d0   : > { %782 = shalt.err (!%p779_p13)
}
 0x1d1   : > { %698 = dma.vmem_to_hbm [thread:$0]  (%p908_p4), %s505_s15, 128, %s502_s24, %s491_s25  }
 0x1d2 PF: > { %p704_p0 = scmp.ge.s32.totalorder %s833_s23, 2  ;;  %s516_s14 = sand.u32 1, %s813_s18  }
 0x1d3   : > { %s517_s16 = scalar_lea.sflag [#allocation4], %s516_s14 }
 0x1d4   : > { %p701_p1 = pnand %p704_p0, %p915_p8 }
 0x1d6   : > { %p702_p2 = pneg %p701_p1 }
 0x1d8   : > { %808 = dma.done.wait (%p702_p2), %s517_s16, 128  }
 0x1d9   : > { %810 = vsyncadd (%p702_p2), %s517_s16, 4294967168  ;;  %s18_s23 = sadd.s32 1, %s833_s23   ;;  %s1066_s18 = smov %s817_s19 }
 0x1da   : > { %p15_p3 = scmp.ge.s32.totalorder %s18_s23, 4   ;;  %s1067_s19 = smov %s821_s20 }
 0x1db   : > { %s1068_s20 = smov %s921_s6  ;;  %s1069_s21 = smov %s829_s22 }
 0x1dc   : > { %s1070_s22 = smov %s1072_s26  ;;  %17 = sbr.rel (!%p15_p3) target bundleno = 4 (0x4), region = 96 }
 0x1e1   :  { %522 = vsyncpa [#allocation4], 1 }
 0x1e2   :  { %524 = vsyncpa [#allocation4 + $0x1], 1 }

</bundles_post_ra>
